<compile_context>
chip_gen: v7x
topology: tpu7x:2x2x1
jax: 0.10.0
libtpu: 0.0.40
codegen_flags: <defaults>
</compile_context>

<pallas_src>
import jax
import jax.numpy as jnp
from jax import lax
from jax.experimental import pallas as pl
from jax.experimental.pallas import tpu as pltpu


def _double_conv_kernel(x_ref, w1_ref, w2_ref, g1_ref, be1_ref, g2_ref, be2_ref,
                        gsum_ref, gexp_ref, out_ref, xpad1_ref, xpad2_ref):
    N, H, K1 = x_ref.shape
    WC = out_ref.shape[2]            # W * out_ch (lane-dense, 128 here)
    C = g1_ref.shape[1]              # out_ch (same for both convs in double_conv)
    W = WC // C
    eps = 1e-5
    inv_cnt = 1.0 / float(N * H * W)

    def conv3x3(xpad_ref, wb_ref):
        # xpad_ref: (N, H+2, K) bf16 zero-padded scratch (H halo rows; W padding is
        # folded into the banded weights).  wb_ref: (3, K, W*C) bf16 banded taps.
        n, hp2, k = xpad_ref.shape
        h = hp2 - 2
        acc = jnp.zeros((n * h, wb_ref.shape[2]), jnp.float32)
        for kh in range(3):                                      # 3 matmuls per conv
            slab = xpad_ref[:, pl.ds(kh, h), :].reshape(n * h, k)
            acc = acc + jnp.dot(slab, wb_ref[kh],
                                preferred_element_type=jnp.float32)
        return acc                                               # (N*H, W*C) f32

    def bn_relu(acc, g_ref, be_ref):
        # Training-mode BN, single-pass stats, folded to one per-channel scale/shift.
        # Stats + epilogue stay f32 (v5e-safe); tiny reductions/broadcasts ride the MXU.
        s = jnp.sum(acc, axis=0, keepdims=True)                  # (1, W*C)
        ss = jnp.sum(acc * acc, axis=0, keepdims=True)           # (1, W*C)
        stats = jnp.concatenate([s, ss], axis=0)                 # (2, W*C)
        red = jnp.dot(stats, gsum_ref[...],
                      preferred_element_type=jnp.float32) * inv_cnt   # (2, C)
        mean = red[0:1]
        var = red[1:2] - mean * mean
        scale = g_ref[...] * lax.rsqrt(var + eps)                # (1, C)
        shift = be_ref[...] - mean * scale                       # (1, C)
        ssh = jnp.concatenate([scale, shift], axis=0)            # (2, C)
        ssl = jnp.dot(ssh, gexp_ref[...],
                      preferred_element_type=jnp.float32)        # (2, W*C)
        return jnp.maximum(acc * ssl[0:1] + ssl[1:2], 0.0)

    # ---- build padded conv1 input in VMEM scratch (halo rows zeroed once) ----
    zh1 = jnp.zeros((N, 1, K1), xpad1_ref.dtype)
    xpad1_ref[:, pl.ds(0, 1), :] = zh1
    xpad1_ref[:, pl.ds(H + 1, 1), :] = zh1
    xpad1_ref[:, pl.ds(1, H), :] = x_ref[...]                    # already bf16

    zh2 = jnp.zeros((N, 1, WC), xpad2_ref.dtype)
    xpad2_ref[:, pl.ds(0, 1), :] = zh2
    xpad2_ref[:, pl.ds(H + 1, 1), :] = zh2

    # ---- conv1 -> BN -> ReLU ----
    acc1 = conv3x3(xpad1_ref, w1_ref)                            # bias cancels in BN
    y1 = bn_relu(acc1, g1_ref, be1_ref)                          # (N*H, W*C) f32

    # ---- conv2 -> BN -> ReLU ----
    xpad2_ref[:, pl.ds(1, H), :] = y1.reshape(N, H, WC).astype(xpad2_ref.dtype)
    acc2 = conv3x3(xpad2_ref, w2_ref)
    y2 = bn_relu(acc2, g2_ref, be2_ref)
    out_ref[...] = y2.reshape(N, H, WC)


def _band_weights(w_hwio, W):
    """Fold the kw taps of a 3x3 conv (and the W zero-padding) into banded matrices.

    Returns (3, W*Cin, W*Cout) where, for each kh,
      B[kh][wp*Cin + ci, w*Cout + co] = w_hwio[kh, wp - w + 1, ci, co] if |wp - w| <= 1 else 0.
    Rows for wp outside [0, W) simply do not exist, which implements padding=1 in W.
    Toy-W formulation only (band density 3/W); see TODO(synk) at top for production.
    """
    _, _, Cin, Cout = w_hwio.shape
    E = jnp.stack([jnp.eye(W, k=1 - kw, dtype=w_hwio.dtype) for kw in range(3)])  # (3, W, W)
    B = jnp.einsum('kpw,hkio->hpiwo', E, w_hwio)                                  # (3,W,Cin,W,Cout)
    return B.reshape(3, W * Cin, W * Cout)


def inconv_forward(x_nchw, params, *, matmul_dtype=jnp.bfloat16):
    """params: (w1, b1, g1, be1, w2, b2, g2, be2); conv weights in HWIO (3,3,in,out).

    Conv biases b1/b2 are accepted for API parity but unused: a per-channel constant
    added before training-mode BatchNorm cancels exactly.  matmul_dtype controls the
    MXU operand precision (bf16 default; pass jnp.float32 for bit-tight accuracy).
    """
    w1, _b1, g1, be1, w2, _b2, g2, be2 = params
    N, Cin, H, W = x_nchw.shape
    C1 = w1.shape[3]
    C2 = w2.shape[3]
    assert C1 == C2, "double_conv uses out_ch for both convs"
    C = C2

    # NCHW -> lane-dense packed (N, H, W*Cin), cast to the MXU dtype up front
    # (halves activation DMA bytes when bf16).
    x_packed = (jnp.transpose(x_nchw, (0, 2, 3, 1))
                .reshape(N, H, W * Cin).astype(matmul_dtype))

    # Banded conv weights (kw taps + W padding folded into the matmul), MXU dtype.
    w1b = _band_weights(w1.astype(jnp.float32), W).astype(matmul_dtype)  # (3, W*Cin, W*C)
    w2b = _band_weights(w2.astype(jnp.float32), W).astype(matmul_dtype)  # (3, W*C,   W*C)

    # Constant matrices for per-channel reduce / broadcast over the packed lane axis
    # (kept f32: they carry the BN statistics path).
    gsum = jnp.tile(jnp.eye(C, dtype=jnp.float32), (W, 1))   # (W*C, C)
    gexp = gsum.T                                            # (C, W*C)

    args = (x_packed, w1b, w2b,
            g1.reshape(1, C).astype(jnp.float32), be1.reshape(1, C).astype(jnp.float32),
            g2.reshape(1, C).astype(jnp.float32), be2.reshape(1, C).astype(jnp.float32),
            gsum, gexp)

    vmem = pl.BlockSpec(memory_space=pltpu.MemorySpace.VMEM)
    out_packed = pl.pallas_call(
        _double_conv_kernel,
        out_shape=jax.ShapeDtypeStruct((N, H, W * C), jnp.float32),
        in_specs=[vmem] * len(args),
        out_specs=vmem,
        scratch_shapes=[
            pltpu.VMEM((N, H + 2, W * Cin), matmul_dtype),   # padded conv1 input
            pltpu.VMEM((N, H + 2, W * C), matmul_dtype),     # padded conv2 input
        ],
        # TODO(synk): derive vmem_limit_bytes per chip generation (v7x: 64 MiB
        # physical) once the production H-row-tiled grid version lands.
        compiler_params=pltpu.CompilerParams(vmem_limit_bytes=32 * 1024 * 1024),
    )(*args)

    out_nhwc = out_packed.reshape(N, H, W, C)
    return jnp.transpose(out_nhwc, (0, 3, 1, 2))


def _ref_forward(x_nchw, params):
    """Pure-JAX f32 reference of double_conv with training-mode BatchNorm (bias included)."""
    w1, b1, g1, be1, w2, b2, g2, be2 = params

    def conv_bn_relu(x, w_hwio, b, g, be):
        w_oihw = jnp.transpose(w_hwio, (3, 2, 0, 1))
        y = lax.conv_general_dilated(x, w_oihw, (1, 1), 'SAME',
                                     dimension_numbers=('NCHW', 'OIHW', 'NCHW'))
        y = y + b[None, :, None, None]
        mean = jnp.mean(y, axis=(0, 2, 3), keepdims=True)
        var = jnp.mean((y - mean) ** 2, axis=(0, 2, 3), keepdims=True)
        y = (y - mean) * lax.rsqrt(var + 1e-5) * g[None, :, None, None] + be[None, :, None, None]
        return jnp.maximum(y, 0.0)

    y = conv_bn_relu(x_nchw, w1, b1, g1, be1)
    y = conv_bn_relu(y, w2, b2, g2, be2)
    return y


if __name__ == "__main__":
    N, Cin, H, W = 2, 4, 16, 16
    Cout = 8

    key = jax.random.PRNGKey(0)
    k = jax.random.split(key, 9)
    x = jax.random.normal(k[0], (N, Cin, H, W), jnp.float32)

    # deterministic synthetic parameters (shapes from nn.Conv2d / nn.BatchNorm2d)
    w1 = jax.random.normal(k[1], (3, 3, Cin, Cout), jnp.float32) * 0.1   # HWIO
    b1 = jax.random.normal(k[2], (Cout,), jnp.float32) * 0.1
    g1 = 1.0 + 0.1 * jax.random.normal(k[3], (Cout,), jnp.float32)
    be1 = 0.1 * jax.random.normal(k[4], (Cout,), jnp.float32)
    w2 = jax.random.normal(k[5], (3, 3, Cout, Cout), jnp.float32) * 0.1  # HWIO
    b2 = jax.random.normal(k[6], (Cout,), jnp.float32) * 0.1
    g2 = 1.0 + 0.1 * jax.random.normal(k[7], (Cout,), jnp.float32)
    be2 = 0.1 * jax.random.normal(k[8], (Cout,), jnp.float32)

    params = (w1, b1, g1, be1, w2, b2, g2, be2)

    out = inconv_forward(x, params)                 # bf16 MXU path (default)
    out = jax.block_until_ready(out)

    ref = _ref_forward(x, params)
    assert out.shape == (N, Cout, H, W)
    # Tolerance loosened vs the f32 reference because the conv matmuls run in bf16
    # (f32 accumulation); pass matmul_dtype=jnp.float32 for ~1e-5 agreement.
    assert jnp.allclose(out, ref, atol=5e-2, rtol=5e-2), (
        f"max abs diff {float(jnp.max(jnp.abs(out - ref)))}")

    print("KERNEL_OK")
</pallas_src>

<mosaic_0001>
module attributes {stable_mosaic.version = 11 : i64} {
  func.func @_double_conv_kernel(%arg0: memref<2x16x64xbf16, #tpu.memory_space<vmem>>, %arg1: memref<3x64x128xbf16, #tpu.memory_space<vmem>>, %arg2: memref<3x128x128xbf16, #tpu.memory_space<vmem>>, %arg3: memref<1x8xf32, #tpu.memory_space<vmem>>, %arg4: memref<1x8xf32, #tpu.memory_space<vmem>>, %arg5: memref<1x8xf32, #tpu.memory_space<vmem>>, %arg6: memref<1x8xf32, #tpu.memory_space<vmem>>, %arg7: memref<128x8xf32, #tpu.memory_space<vmem>>, %arg8: memref<8x128xf32, #tpu.memory_space<vmem>>, %arg9: memref<2x16x128xf32, #tpu.memory_space<vmem>>, %arg10: memref<2x18x64xbf16, #tpu.memory_space<vmem>>, %arg11: memref<2x18x128xbf16, #tpu.memory_space<vmem>>) attributes {dimension_semantics = [], scalar_prefetch = 0 : i64, scratch_operands = 2 : i64, tpu.core_type = #tpu.core_type<tc>} {
    %cst = arith.constant 0.000000e+00 : bf16
    %0 = vector.broadcast %cst : bf16 to vector<2x1x64xbf16>
    %c0 = arith.constant 0 : index
    %c0_0 = arith.constant 0 : index
    %c0_1 = arith.constant 0 : index
    %1 = vector.load %arg10[%c0, %c0_0, %c0_1] : memref<2x18x64xbf16, #tpu.memory_space<vmem>>, vector<2x1x64xbf16>
    tpu.vector_store %arg10[%c0, %c0_0, %c0_1], %0 {strides = array<i32>} : memref<2x18x64xbf16, #tpu.memory_space<vmem>>, vector<2x1x64xbf16>,
    %c0_2 = arith.constant 0 : index
    %c17 = arith.constant 17 : index
    %c0_3 = arith.constant 0 : index
    %2 = vector.load %arg10[%c0_2, %c17, %c0_3] : memref<2x18x64xbf16, #tpu.memory_space<vmem>>, vector<2x1x64xbf16>
    tpu.vector_store %arg10[%c0_2, %c17, %c0_3], %0 {strides = array<i32>} : memref<2x18x64xbf16, #tpu.memory_space<vmem>>, vector<2x1x64xbf16>,
    %c0_4 = arith.constant 0 : index
    %c0_5 = arith.constant 0 : index
    %c0_6 = arith.constant 0 : index
    %3 = vector.load %arg0[%c0_4, %c0_5, %c0_6] : memref<2x16x64xbf16, #tpu.memory_space<vmem>>, vector<2x16x64xbf16>
    %c0_7 = arith.constant 0 : index
    %c1 = arith.constant 1 : index
    %c0_8 = arith.constant 0 : index
    %4 = vector.load %arg10[%c0_7, %c1, %c0_8] : memref<2x18x64xbf16, #tpu.memory_space<vmem>>, vector<2x16x64xbf16>
    tpu.vector_store %arg10[%c0_7, %c1, %c0_8], %3 {strides = array<i32>} : memref<2x18x64xbf16, #tpu.memory_space<vmem>>, vector<2x16x64xbf16>,
    %cst_9 = arith.constant 0.000000e+00 : bf16
    %5 = vector.broadcast %cst_9 : bf16 to vector<2x1x128xbf16>
    %c0_10 = arith.constant 0 : index
    %c0_11 = arith.constant 0 : index
    %c0_12 = arith.constant 0 : index
    %6 = vector.load %arg11[%c0_10, %c0_11, %c0_12] : memref<2x18x128xbf16, #tpu.memory_space<vmem>>, vector<2x1x128xbf16>
    tpu.vector_store %arg11[%c0_10, %c0_11, %c0_12], %5 {strides = array<i32>} : memref<2x18x128xbf16, #tpu.memory_space<vmem>>, vector<2x1x128xbf16>,
    %c0_13 = arith.constant 0 : index
    %c17_14 = arith.constant 17 : index
    %c0_15 = arith.constant 0 : index
    %7 = vector.load %arg11[%c0_13, %c17_14, %c0_15] : memref<2x18x128xbf16, #tpu.memory_space<vmem>>, vector<2x1x128xbf16>
    tpu.vector_store %arg11[%c0_13, %c17_14, %c0_15], %5 {strides = array<i32>} : memref<2x18x128xbf16, #tpu.memory_space<vmem>>, vector<2x1x128xbf16>,
    %cst_16 = arith.constant 0.000000e+00 : f32
    %8 = vector.broadcast %cst_16 : f32 to vector<32x128xf32>
    %c0_17 = arith.constant 0 : index
    %c0_18 = arith.constant 0 : index
    %c0_19 = arith.constant 0 : index
    %9 = vector.load %arg10[%c0_17, %c0_18, %c0_19] : memref<2x18x64xbf16, #tpu.memory_space<vmem>>, vector<2x16x64xbf16>
    %10 = vector.shape_cast %9 : vector<2x16x64xbf16> to vector<32x64xbf16>
    %c0_20 = arith.constant 0 : index
    %c0_21 = arith.constant 0 : index
    %c0_22 = arith.constant 0 : index
    %11 = vector.load %arg1[%c0_20, %c0_21, %c0_22] : memref<3x64x128xbf16, #tpu.memory_space<vmem>>, vector<1x64x128xbf16>
    %12 = vector.shape_cast %11 : vector<1x64x128xbf16> to vector<64x128xbf16>
    %cst_23 = arith.constant dense<0.000000e+00> : vector<32x128xf32>
    %13 = tpu.matmul %10, %12, %cst_23 {dimension_numbers = #tpu.dot_dimension_numbers<[1], [0], [0], [1], [0, 0, 1, 1], [], []>} : vector<32x64xbf16>, vector<64x128xbf16>, vector<32x128xf32> -> vector<32x128xf32>
    %14 = arith.addf %8, %13 : vector<32x128xf32>
    %c0_24 = arith.constant 0 : index
    %c1_25 = arith.constant 1 : index
    %c0_26 = arith.constant 0 : index
    %15 = vector.load %arg10[%c0_24, %c1_25, %c0_26] : memref<2x18x64xbf16, #tpu.memory_space<vmem>>, vector<2x16x64xbf16>
    %16 = vector.shape_cast %15 : vector<2x16x64xbf16> to vector<32x64xbf16>
    %c1_27 = arith.constant 1 : index
    %c0_28 = arith.constant 0 : index
    %c0_29 = arith.constant 0 : index
    %17 = vector.load %arg1[%c1_27, %c0_28, %c0_29] : memref<3x64x128xbf16, #tpu.memory_space<vmem>>, vector<1x64x128xbf16>
    %18 = vector.shape_cast %17 : vector<1x64x128xbf16> to vector<64x128xbf16>
    %cst_30 = arith.constant dense<0.000000e+00> : vector<32x128xf32>
    %19 = tpu.matmul %16, %18, %cst_30 {dimension_numbers = #tpu.dot_dimension_numbers<[1], [0], [0], [1], [0, 0, 1, 1], [], []>} : vector<32x64xbf16>, vector<64x128xbf16>, vector<32x128xf32> -> vector<32x128xf32>
    %20 = arith.addf %14, %19 : vector<32x128xf32>
    %c0_31 = arith.constant 0 : index
    %c2 = arith.constant 2 : index
    %c0_32 = arith.constant 0 : index
    %21 = vector.load %arg10[%c0_31, %c2, %c0_32] : memref<2x18x64xbf16, #tpu.memory_space<vmem>>, vector<2x16x64xbf16>
    %22 = vector.shape_cast %21 : vector<2x16x64xbf16> to vector<32x64xbf16>
    %c2_33 = arith.constant 2 : index
    %c0_34 = arith.constant 0 : index
    %c0_35 = arith.constant 0 : index
    %23 = vector.load %arg1[%c2_33, %c0_34, %c0_35] : memref<3x64x128xbf16, #tpu.memory_space<vmem>>, vector<1x64x128xbf16>
    %24 = vector.shape_cast %23 : vector<1x64x128xbf16> to vector<64x128xbf16>
    %cst_36 = arith.constant dense<0.000000e+00> : vector<32x128xf32>
    %25 = tpu.matmul %22, %24, %cst_36 {dimension_numbers = #tpu.dot_dimension_numbers<[1], [0], [0], [1], [0, 0, 1, 1], [], []>} : vector<32x64xbf16>, vector<64x128xbf16>, vector<32x128xf32> -> vector<32x128xf32>
    %26 = arith.addf %20, %25 : vector<32x128xf32>
    %cst_37 = arith.constant dense<0.000000e+00> : vector<128xf32>
    %27 = vector.multi_reduction <add>, %26, %cst_37 [0] : vector<32x128xf32> to vector<128xf32>
    %28 = vector.shape_cast %27 : vector<128xf32> to vector<1x128xf32>
    %29 = arith.mulf %26, %26 : vector<32x128xf32>
    %cst_38 = arith.constant dense<0.000000e+00> : vector<128xf32>
    %30 = vector.multi_reduction <add>, %29, %cst_38 [0] : vector<32x128xf32> to vector<128xf32>
    %31 = vector.shape_cast %30 : vector<128xf32> to vector<1x128xf32>
    %32 = tpu.concatenate %28, %31 in 0 : vector<1x128xf32>, vector<1x128xf32> -> vector<2x128xf32>
    %c0_39 = arith.constant 0 : index
    %c0_40 = arith.constant 0 : index
    %33 = vector.load %arg7[%c0_39, %c0_40] : memref<128x8xf32, #tpu.memory_space<vmem>>, vector<128x8xf32>
    %cst_41 = arith.constant dense<0.000000e+00> : vector<2x8xf32>
    %34 = tpu.matmul %32, %33, %cst_41 {dimension_numbers = #tpu.dot_dimension_numbers<[1], [0], [0], [1], [0, 0, 1, 1], [], []>} : vector<2x128xf32>, vector<128x8xf32>, vector<2x8xf32> -> vector<2x8xf32>
    %cst_42 = arith.constant 0.001953125 : f32
    %35 = vector.broadcast %cst_42 : f32 to vector<2x8xf32>
    %36 = arith.mulf %34, %35 : vector<2x8xf32>
    %37 = vector.extract_strided_slice %36 {offsets = [0, 0], sizes = [1, 8], strides = [1, 1]} : vector<2x8xf32> to vector<1x8xf32>
    %38 = vector.extract_strided_slice %36 {offsets = [1, 0], sizes = [1, 8], strides = [1, 1]} : vector<2x8xf32> to vector<1x8xf32>
    %39 = arith.mulf %37, %37 : vector<1x8xf32>
    %40 = arith.subf %38, %39 : vector<1x8xf32>
    %c0_43 = arith.constant 0 : index
    %c0_44 = arith.constant 0 : index
    %41 = vector.load %arg3[%c0_43, %c0_44] : memref<1x8xf32, #tpu.memory_space<vmem>>, vector<1x8xf32>
    %cst_45 = arith.constant 9.99999974E-6 : f32
    %42 = vector.broadcast %cst_45 : f32 to vector<1x8xf32>
    %43 = arith.addf %40, %42 : vector<1x8xf32>
    %44 = math.rsqrt %43 : vector<1x8xf32>
    %45 = arith.mulf %41, %44 : vector<1x8xf32>
    %c0_46 = arith.constant 0 : index
    %c0_47 = arith.constant 0 : index
    %46 = vector.load %arg4[%c0_46, %c0_47] : memref<1x8xf32, #tpu.memory_space<vmem>>, vector<1x8xf32>
    %47 = arith.mulf %37, %45 : vector<1x8xf32>
    %48 = arith.subf %46, %47 : vector<1x8xf32>
    %49 = tpu.concatenate %45, %48 in 0 : vector<1x8xf32>, vector<1x8xf32> -> vector<2x8xf32>
    %c0_48 = arith.constant 0 : index
    %c0_49 = arith.constant 0 : index
    %50 = vector.load %arg8[%c0_48, %c0_49] : memref<8x128xf32, #tpu.memory_space<vmem>>, vector<8x128xf32>
    %cst_50 = arith.constant dense<0.000000e+00> : vector<2x128xf32>
    %51 = tpu.matmul %49, %50, %cst_50 {dimension_numbers = #tpu.dot_dimension_numbers<[1], [0], [0], [1], [0, 0, 1, 1], [], []>} : vector<2x8xf32>, vector<8x128xf32>, vector<2x128xf32> -> vector<2x128xf32>
    %52 = vector.extract_strided_slice %51 {offsets = [0, 0], sizes = [1, 128], strides = [1, 1]} : vector<2x128xf32> to vector<1x128xf32>
    %53 = vector.broadcast %52 : vector<1x128xf32> to vector<32x128xf32>
    %54 = arith.mulf %26, %53 : vector<32x128xf32>
    %55 = vector.extract_strided_slice %51 {offsets = [1, 0], sizes = [1, 128], strides = [1, 1]} : vector<2x128xf32> to vector<1x128xf32>
    %56 = vector.broadcast %55 : vector<1x128xf32> to vector<32x128xf32>
    %57 = arith.addf %54, %56 : vector<32x128xf32>
    %cst_51 = arith.constant 0.000000e+00 : f32
    %58 = vector.broadcast %cst_51 : f32 to vector<32x128xf32>
    %59 = arith.maximumf %57, %58 : vector<32x128xf32>
    %60 = vector.shape_cast %59 : vector<32x128xf32> to vector<2x16x128xf32>
    %61 = arith.truncf %60 : vector<2x16x128xf32> to vector<2x16x128xbf16>
    %c0_52 = arith.constant 0 : index
    %c1_53 = arith.constant 1 : index
    %c0_54 = arith.constant 0 : index
    %62 = vector.load %arg11[%c0_52, %c1_53, %c0_54] : memref<2x18x128xbf16, #tpu.memory_space<vmem>>, vector<2x16x128xbf16>
    tpu.vector_store %arg11[%c0_52, %c1_53, %c0_54], %61 {strides = array<i32>} : memref<2x18x128xbf16, #tpu.memory_space<vmem>>, vector<2x16x128xbf16>,
    %cst_55 = arith.constant 0.000000e+00 : f32
    %63 = vector.broadcast %cst_55 : f32 to vector<32x128xf32>
    %c0_56 = arith.constant 0 : index
    %c0_57 = arith.constant 0 : index
    %c0_58 = arith.constant 0 : index
    %64 = vector.load %arg11[%c0_56, %c0_57, %c0_58] : memref<2x18x128xbf16, #tpu.memory_space<vmem>>, vector<2x16x128xbf16>
    %65 = vector.shape_cast %64 : vector<2x16x128xbf16> to vector<32x128xbf16>
    %c0_59 = arith.constant 0 : index
    %c0_60 = arith.constant 0 : index
    %c0_61 = arith.constant 0 : index
    %66 = vector.load %arg2[%c0_59, %c0_60, %c0_61] : memref<3x128x128xbf16, #tpu.memory_space<vmem>>, vector<1x128x128xbf16>
    %67 = vector.shape_cast %66 : vector<1x128x128xbf16> to vector<128x128xbf16>
    %cst_62 = arith.constant dense<0.000000e+00> : vector<32x128xf32>
    %68 = tpu.matmul %65, %67, %cst_62 {dimension_numbers = #tpu.dot_dimension_numbers<[1], [0], [0], [1], [0, 0, 1, 1], [], []>} : vector<32x128xbf16>, vector<128x128xbf16>, vector<32x128xf32> -> vector<32x128xf32>
    %69 = arith.addf %63, %68 : vector<32x128xf32>
    %c0_63 = arith.constant 0 : index
    %c1_64 = arith.constant 1 : index
    %c0_65 = arith.constant 0 : index
    %70 = vector.load %arg11[%c0_63, %c1_64, %c0_65] : memref<2x18x128xbf16, #tpu.memory_space<vmem>>, vector<2x16x128xbf16>
    %71 = vector.shape_cast %70 : vector<2x16x128xbf16> to vector<32x128xbf16>
    %c1_66 = arith.constant 1 : index
    %c0_67 = arith.constant 0 : index
    %c0_68 = arith.constant 0 : index
    %72 = vector.load %arg2[%c1_66, %c0_67, %c0_68] : memref<3x128x128xbf16, #tpu.memory_space<vmem>>, vector<1x128x128xbf16>
    %73 = vector.shape_cast %72 : vector<1x128x128xbf16> to vector<128x128xbf16>
    %cst_69 = arith.constant dense<0.000000e+00> : vector<32x128xf32>
    %74 = tpu.matmul %71, %73, %cst_69 {dimension_numbers = #tpu.dot_dimension_numbers<[1], [0], [0], [1], [0, 0, 1, 1], [], []>} : vector<32x128xbf16>, vector<128x128xbf16>, vector<32x128xf32> -> vector<32x128xf32>
    %75 = arith.addf %69, %74 : vector<32x128xf32>
    %c0_70 = arith.constant 0 : index
    %c2_71 = arith.constant 2 : index
    %c0_72 = arith.constant 0 : index
    %76 = vector.load %arg11[%c0_70, %c2_71, %c0_72] : memref<2x18x128xbf16, #tpu.memory_space<vmem>>, vector<2x16x128xbf16>
    %77 = vector.shape_cast %76 : vector<2x16x128xbf16> to vector<32x128xbf16>
    %c2_73 = arith.constant 2 : index
    %c0_74 = arith.constant 0 : index
    %c0_75 = arith.constant 0 : index
    %78 = vector.load %arg2[%c2_73, %c0_74, %c0_75] : memref<3x128x128xbf16, #tpu.memory_space<vmem>>, vector<1x128x128xbf16>
    %79 = vector.shape_cast %78 : vector<1x128x128xbf16> to vector<128x128xbf16>
    %cst_76 = arith.constant dense<0.000000e+00> : vector<32x128xf32>
    %80 = tpu.matmul %77, %79, %cst_76 {dimension_numbers = #tpu.dot_dimension_numbers<[1], [0], [0], [1], [0, 0, 1, 1], [], []>} : vector<32x128xbf16>, vector<128x128xbf16>, vector<32x128xf32> -> vector<32x128xf32>
    %81 = arith.addf %75, %80 : vector<32x128xf32>
    %cst_77 = arith.constant dense<0.000000e+00> : vector<128xf32>
    %82 = vector.multi_reduction <add>, %81, %cst_77 [0] : vector<32x128xf32> to vector<128xf32>
    %83 = vector.shape_cast %82 : vector<128xf32> to vector<1x128xf32>
    %84 = arith.mulf %81, %81 : vector<32x128xf32>
    %cst_78 = arith.constant dense<0.000000e+00> : vector<128xf32>
    %85 = vector.multi_reduction <add>, %84, %cst_78 [0] : vector<32x128xf32> to vector<128xf32>
    %86 = vector.shape_cast %85 : vector<128xf32> to vector<1x128xf32>
    %87 = tpu.concatenate %83, %86 in 0 : vector<1x128xf32>, vector<1x128xf32> -> vector<2x128xf32>
    %c0_79 = arith.constant 0 : index
    %c0_80 = arith.constant 0 : index
    %88 = vector.load %arg7[%c0_79, %c0_80] : memref<128x8xf32, #tpu.memory_space<vmem>>, vector<128x8xf32>
    %cst_81 = arith.constant dense<0.000000e+00> : vector<2x8xf32>
    %89 = tpu.matmul %87, %88, %cst_81 {dimension_numbers = #tpu.dot_dimension_numbers<[1], [0], [0], [1], [0, 0, 1, 1], [], []>} : vector<2x128xf32>, vector<128x8xf32>, vector<2x8xf32> -> vector<2x8xf32>
    %cst_82 = arith.constant 0.001953125 : f32
    %90 = vector.broadcast %cst_82 : f32 to vector<2x8xf32>
    %91 = arith.mulf %89, %90 : vector<2x8xf32>
    %92 = vector.extract_strided_slice %91 {offsets = [0, 0], sizes = [1, 8], strides = [1, 1]} : vector<2x8xf32> to vector<1x8xf32>
    %93 = vector.extract_strided_slice %91 {offsets = [1, 0], sizes = [1, 8], strides = [1, 1]} : vector<2x8xf32> to vector<1x8xf32>
    %94 = arith.mulf %92, %92 : vector<1x8xf32>
    %95 = arith.subf %93, %94 : vector<1x8xf32>
    %c0_83 = arith.constant 0 : index
    %c0_84 = arith.constant 0 : index
    %96 = vector.load %arg5[%c0_83, %c0_84] : memref<1x8xf32, #tpu.memory_space<vmem>>, vector<1x8xf32>
    %cst_85 = arith.constant 9.99999974E-6 : f32
    %97 = vector.broadcast %cst_85 : f32 to vector<1x8xf32>
    %98 = arith.addf %95, %97 : vector<1x8xf32>
    %99 = math.rsqrt %98 : vector<1x8xf32>
    %100 = arith.mulf %96, %99 : vector<1x8xf32>
    %c0_86 = arith.constant 0 : index
    %c0_87 = arith.constant 0 : index
    %101 = vector.load %arg6[%c0_86, %c0_87] : memref<1x8xf32, #tpu.memory_space<vmem>>, vector<1x8xf32>
    %102 = arith.mulf %92, %100 : vector<1x8xf32>
    %103 = arith.subf %101, %102 : vector<1x8xf32>
    %104 = tpu.concatenate %100, %103 in 0 : vector<1x8xf32>, vector<1x8xf32> -> vector<2x8xf32>
    %c0_88 = arith.constant 0 : index
    %c0_89 = arith.constant 0 : index
    %105 = vector.load %arg8[%c0_88, %c0_89] : memref<8x128xf32, #tpu.memory_space<vmem>>, vector<8x128xf32>
    %cst_90 = arith.constant dense<0.000000e+00> : vector<2x128xf32>
    %106 = tpu.matmul %104, %105, %cst_90 {dimension_numbers = #tpu.dot_dimension_numbers<[1], [0], [0], [1], [0, 0, 1, 1], [], []>} : vector<2x8xf32>, vector<8x128xf32>, vector<2x128xf32> -> vector<2x128xf32>
    %107 = vector.extract_strided_slice %106 {offsets = [0, 0], sizes = [1, 128], strides = [1, 1]} : vector<2x128xf32> to vector<1x128xf32>
    %108 = vector.broadcast %107 : vector<1x128xf32> to vector<32x128xf32>
    %109 = arith.mulf %81, %108 : vector<32x128xf32>
    %110 = vector.extract_strided_slice %106 {offsets = [1, 0], sizes = [1, 128], strides = [1, 1]} : vector<2x128xf32> to vector<1x128xf32>
    %111 = vector.broadcast %110 : vector<1x128xf32> to vector<32x128xf32>
    %112 = arith.addf %109, %111 : vector<32x128xf32>
    %cst_91 = arith.constant 0.000000e+00 : f32
    %113 = vector.broadcast %cst_91 : f32 to vector<32x128xf32>
    %114 = arith.maximumf %112, %113 : vector<32x128xf32>
    %115 = vector.shape_cast %114 : vector<32x128xf32> to vector<2x16x128xf32>
    %c0_92 = arith.constant 0 : index
    %c0_93 = arith.constant 0 : index
    %c0_94 = arith.constant 0 : index
    %116 = vector.load %arg9[%c0_92, %c0_93, %c0_94] : memref<2x16x128xf32, #tpu.memory_space<vmem>>, vector<2x16x128xf32>
    tpu.vector_store %arg9[%c0_92, %c0_93, %c0_94], %115 {strides = array<i32>} : memref<2x16x128xf32, #tpu.memory_space<vmem>>, vector<2x16x128xf32>,
    return
  }
}

</mosaic_0001>

<bundles_post_ra>
// kernel: tpu_custom_call.1
= control target key start
LH: loop header
LB: loop body
LE: loop exit
PB: predicated region body
PF: predicated region fallthrough
CT: control target
= control target key end

     0   :  { %14 = vsyncpa [#allocation5], 0  ;;  %s2530_s0 = inlined_call_operand.vmem [shape: bf16[2,16,64], index: 0, kind: input, shape index: {}]   ;;  %s2531_s1 = inlined_call_operand.vmem [shape: bf16[3,64,128], index: 1, kind: input, shape index: {}]   ;;  %s2532_s2 = inlined_call_operand.hbm [shape: bf16[3,128,128], index: 2, kind: input, shape index: {}]   ;;  %s2533_s3 = inlined_call_operand.vmem [shape: f32[1,8], index: 3, kind: input, shape index: {}]   ;;  %s2534_s4 = inlined_call_operand.vmem [shape: f32[1,8], index: 4, kind: input, shape index: {}]   ;;  %s2535_s5 = inlined_call_operand.vmem [shape: f32[1,8], index: 5, kind: input, shape index: {}]   ;;  %s2536_s6 = inlined_call_operand.vmem [shape: f32[1,8], index: 6, kind: input, shape index: {}]   ;;  %s2537_s7 = inlined_call_operand.vmem [shape: f32[128,8], index: 7, kind: input, shape index: {}]   ;;  %s2538_s8 = inlined_call_operand.vmem [shape: f32[8,128], index: 8, kind: input, shape index: {}]   ;;  %s2539_s9 = inlined_call_operand.hbm [shape: f32[2,16,128], index: 9, kind: output, shape index: {}]  }
   0x1   :  { %15 = vsyncpa [#allocation6], 0  ;;  %s2043_s30 = smov [#allocation4]   ;;  %s1995_s13 = scalar_lea.hbm %s2532_s2, 3072 }
   0x2   :  { %s25_s10 = sshll.u32 %s2043_s30, 4  ;;  %p1996_p0 = scmp.ne.s32.totalorder %s2532_s2, %s1995_s13  ;;  %s26_s10 = int_to_ptr.vmem [resolvable:$true] %s25_s10 }
   0x3   :  { %p1999_p1 = scmp.lt.u32.totalorder %s1995_s13, %s2532_s2 }
   0x5   :  { %p2001_p2 = pnand %p1999_p1, %p1996_p0 }
   0x7   :  { %2004 = shalt.err (!%p2001_p2)
}
   0x8   :  { %s2005_s18 = scalar_lea.vmem %s26_s10, 3072  ;;  %p2010_p4 = scmp.lt.s32.totalorder %s26_s10, %s26_s10 }
   0x9   :  { %p2006_p3 = scmp.ne.s32.totalorder %s26_s10, %s2005_s18  ;;  %p2011_p5 = scmp.lt.s32.totalorder %s2005_s18, %s2005_s18 }
   0xb   :  { %p2012_p6 = por %p2011_p5, %p2010_p4 }
   0xd   :  { %p2013_p7 = pnand %p2012_p6, %p2006_p3 }
   0xf   :  { %2016 = shalt.err (!%p2013_p7)
}
  0x10   :  { %s2044_s19 = smov 64   ;;  %s2045_s20 = smov 4  }
  0x11   :  { %31 = dma.hbm_to_vmem [thread:$0]  %s2532_s2, 3072, %s26_s10, [#allocation5], %s2044_s19, %s2044_s19, %s2045_s20  }
  0x12   :  { %2039 = dma.done.wait [#allocation5], 3072  }
  0x13   :  { %2040 = vsyncadd [#allocation5], 4294964224  ;;  %vm48_vm0 = vcmask 516096   ;;  %vm49_vm1 = vsmask.f32 256  ;;  %v1951_v1 = vld [vmem:[%s2531_s1 + $0x20] sm:$0xff]  }
  0x14   :  { %vm2116_vm2 = vmand %vm48_vm0, %vm49_vm1  ;;  %vm57_vm3 = vsmask.f32 7938  ;;  %v1952_v2 = vld [vmem:[%s2531_s1 + $0x28] sm:$0xff]   ;;  %1701 = vmatprep.subr.bf16.mxu0 %v1951_v1  ;;  %vm69_vm5 = vsmask.f32 4368  ;;  %v1953_v4 = vld [vmem:[%s2531_s1 + $0x30] sm:$0xff]  }
  0x15   :  { %vm2127_vm4 = vmand %vm48_vm0, %vm57_vm3  ;;  %1702 = vmatpush3.bf16.msra.mxu0 %v1951_v1  ;;  %v51_v5 = vld [vmem:[#allocation2] sm:$0x1]  ;;  %v54_v6 = vld [vmem:[#allocation2 + $0xc] sm:$0x1]  ;;  %vm111_vm6 = vcmask 519168   ;;  %vm247_vm12 = vcmask 523264  }
  0x16   :  { %1703 = vmatprep.subr.bf16.mxu0 %v1952_v2  ;;  %v59_v7 = vld [vmem:[#allocation2 + $0x8] sm:$0x1]  ;;  %v52_v8 = vsel %vm2116_vm2, 0, %v51_v5  ;;  %v55_v9 = vsel %vm2116_vm2, 0, %v54_v6  ;;  %v62_v11 = vld [vmem:[#allocation2 + $0x14] sm:$0x1]  ;;  %vm2159_vm7 = vmor %vm49_vm1, %vm69_vm5 }
  0x17   :  { %v60_v10 = vsel %vm2127_vm4, 0, %v59_v7  ;;  %v1954_v12 = vld [vmem:[%s2531_s1 + $0x38] sm:$0xff]   ;;  %53 = vst [vmem:[#allocation2] sm:$0x1] %v52_v8  ;;  %56 = vst [vmem:[#allocation2 + $0xc] sm:$0x1] %v55_v9 }
  0x18   :  { %61 = vst [vmem:[#allocation2 + $0x8] sm:$0x1] %v60_v10  ;;  %v63_v13 = vsel %vm2127_vm4, 0, %v62_v11  ;;  %v65_v14 = vld [vmem:[%s2530_s0] sm:$0xf]  ;;  %vm2170_vm8 = vmand %vm111_vm6, %vm57_vm3  ;;  %vm398_vm13 = vcmask 1042432  }
  0x19   :  { %v66_v15 = vld [vmem:[%s2530_s0 + $0x4] sm:$0xf]  ;;  %1704 = vmatpush3.bf16.msra.mxu0 %v1952_v2  ;;  %v67_v16 = vld [vmem:[%s2530_s0 + $0x8] sm:$0xf]  ;;  %v68_v17 = vld [vmem:[%s2530_s0 + $0xc] sm:$0xf] }
  0x1a   :  { %v72_v18 = vshrl.u32 %v65_v14, 16  ;;  %v75_v19 = vshll.u32 %v65_v14, 16  ;;  %64 = vst [vmem:[#allocation2 + $0x14] sm:$0x1] %v63_v13  ;;  %1705 = vmatprep.subr.bf16.mxu0 %v1953_v4  ;;  %v80_v20 = vshrl.u32 %v66_v15, 16  ;;  %v83_v21 = vshll.u32 %v66_v15, 16 }
  0x1b   :  { %v89_v22 = vshrl.u32 %v67_v16, 16  ;;  %v92_v23 = vshll.u32 %v67_v16, 16  ;;  %v97_v25 = vshrl.u32 %v68_v17, 16  ;;  %v100_v26 = vshll.u32 %v68_v17, 16  ;;  %v2166_v30 = vld [vmem:[%s2531_s1] sm:$0xff]   ;;  %v1957_v34 = vld [vmem:[%s2531_s1 + $0x10] sm:$0xff]  }
  0x1c   :  { %v74_v24 = vrot.slane %v72_v18, 7  ;;  %v82_v28 = vrot.slane %v80_v20, 7  ;;  %vm157_vm9 = vsmask.f32 3328  ;;  %vm158_vm10 = vsmask.f32 7440 }
  0x1d   :  { %v91_v29 = vrot.slane %v89_v22, 7  ;;  %1706 = vmatpush3.bf16.msra.mxu0 %v1953_v4  ;;  %v99_v33 = vrot.slane %v97_v25, 7  ;;  %vm2209_vm11 = vmor %vm157_vm9, %vm158_vm10  ;;  %vm399_vm14 = vcmask 1046532   ;;  %vm128_vm0 = vcmask 1040384  }
  0x1e   :  { %v77_v31 = vor.u32 %v75_v19, %v74_v24  ;;  %v78_v32 = vrot.slane %v74_v24, 4  ;;  %1707 = vmatprep.subr.bf16.mxu0 %v1954_v12  ;;  %v85_v35 = vor.u32 %v83_v21, %v82_v28  ;;  %v87_v36 = vrot.slane %v82_v28, 4  ;;  %v113_v40 = vld [vmem:[#allocation2] sm:$0xf]  ;;  %v121_v42 = vld [vmem:[#allocation2 + $0xc] sm:$0xf]  ;;  %vm2239_vm15 = vmor %vm398_vm13, %vm399_vm14 }
  0x1f   :  { %v94_v37 = vor.u32 %v92_v23, %v91_v29  ;;  %v95_v38 = vrot.slane %v91_v29, 4  ;;  %v102_v39 = vor.u32 %v100_v26, %v99_v33  ;;  %v118_v41 = vld [vmem:[#allocation2 + $0x8] sm:$0x1]  ;;  %v104_v49 = vrot.slane %v99_v33, 4  ;;  %vm2349_vm4 = vmand %vm128_vm0, %vm49_vm1 }
  0x20   :  { %v86_v43 = vsel %vm2159_vm7, %v78_v32, %v85_v35  ;;  %v114_v44 = vsel %vm2170_vm8, %v77_v31, %v113_v40  ;;  %v119_v45 = vsel %vm2116_vm2, %v87_v36, %v118_v41  ;;  %v1956_v26 = vld [vmem:[%s2531_s1 + $0x8] sm:$0xff]   ;;  %v1958_v36 = vld [vmem:[%s2531_s1 + $0x18] sm:$0xff]   ;;  %vm136_vm5 = vmand %vm128_vm0, %vm57_vm3  ;;  %vm661_vm1 = vcmask 64512  }
  0x21   :  { %v122_v46 = vsel %vm2170_vm8, %v94_v37, %v121_v42  ;;  %v125_v47 = vld [vmem:[#allocation2 + $0x14] sm:$0x1]  ;;  %1708 = vmatpush3.bf16.msra.mxu0 %v1954_v12  ;;  %v103_v48 = vsel %vm2159_vm7, %v95_v38, %v102_v39  ;;  %115 = vst [vmem:[#allocation2] sm:$0xf] %v114_v44  ;;  %117 = vst.msk [vmem:[#allocation2 + $0x4] sm:$0xf] %vm111_vm6, %v86_v43 }
  0x22   :  { %120 = vst [vmem:[#allocation2 + $0x8] sm:$0x1] %v119_v45  ;;  %123 = vst [vmem:[#allocation2 + $0xc] sm:$0xf] %v122_v46  ;;  %1713 = vmatprep.subr.bf16.mxu0 %v2166_v30  ;;  %v126_v50 = vsel %vm2116_vm2, %v104_v49, %v125_v47  ;;  %v1962_v44 = vld [vmem:[%s2531_s1 + $0x48] sm:$0xff]   ;;  %v1963_v46 = vld [vmem:[%s2531_s1 + $0x50] sm:$0xff]  }
  0x23   :  { %124 = vst.msk [vmem:[#allocation2 + $0x10] sm:$0xf] %vm111_vm6, %v103_v48  ;;  %127 = vst [vmem:[#allocation2 + $0x14] sm:$0x1] %v126_v50  ;;  %vm2047_vm2 = vmmov 0   ;;  %vm807_vm6 = vcmask 1043456  }
  0x24   :  { %vm2439_vm8 = vmand %vm807_vm6, %vm57_vm3  ;;  %v1976_v12 = vld [vmem:[#allocation4 + $0x10] sm:$0xff]  }
  0x25   :  { %v1989_v39 = vld [vmem:[#allocation4 + $0xb0] sm:$0xff]  }
  0x28   :  { %v143_v51 = vld [vmem:[#allocation2] sm:$0xf]  ;;  %v2189_v52 = vld [vmem:[#allocation2 + $0x4] sm:$0xf] }
  0x29   :  { %v2191_v53 = vld [vmem:[#allocation2 + $0x8] sm:$0x1]  ;;  %v161_v54 = vshrl.u32 %v143_v51, 16  ;;  %v164_v55 = vshll.u32 %v143_v51, 16  ;;  %v170_v56 = vshll.u32 %v2189_v52, 16  ;;  %v174_v57 = vshrl.u32 %v2189_v52, 16 }
  0x2a   :  { %v2195_v58 = vld [vmem:[#allocation2 + $0xc] sm:$0xf]  ;;  %v180_v59 = vshll.u32 %v2191_v53, 16  ;;  %v2198_v60 = vld [vmem:[#allocation2 + $0x10] sm:$0xf]  ;;  %v406_v28 = vrot.slane %v2191_v53, 5  ;;  %v1547_v31 = vcombine.low %v143_v51, %v2189_v52 }
  0x2b   :  { %v185_v61 = vshrl.u32 %v2195_v58, 16  ;;  %v188_v62 = vshll.u32 %v2195_v58, 16  ;;  %v163_v63 = vrot.slane %v161_v54, 4  ;;  %v166_v0 = vrot.slane %v164_v55, 5  ;;  %v2202_v3 = vld [vmem:[#allocation2 + $0x14] sm:$0x1] }
  0x2c   :  { %v172_v1 = vrot.slane %v170_v56, 5  ;;  %v176_v2 = vrot.slane %v174_v57, 4  ;;  %v182_v4 = vrot.slane %v180_v59, 5  ;;  %v194_v7 = vshll.u32 %v2198_v60, 16  ;;  %v392_v35 = vld [vmem:[#allocation2] sm:$0xe] }
  0x2d   :  { %v187_v5 = vrot.slane %v185_v61, 4  ;;  %v190_v6 = vrot.slane %v188_v62, 5  ;;  %v167_v8 = vor.u32 %v166_v0, %v163_v63  ;;  %v198_v10 = vshrl.u32 %v2198_v60, 16  ;;  %v393_v47 = vld [vmem:[#allocation2 + $0xc] sm:$0xe]  ;;  %v1964_v51 = vld [vmem:[%s2531_s1 + $0x58] sm:$0xff]  }
  0x2e   :  { %v177_v9 = vor.u32 %v176_v2, %v172_v1  ;;  %v204_v11 = vshll.u32 %v2202_v3, 16  ;;  %v196_v14 = vrot.slane %v194_v7, 5  ;;  %v403_v32 = vrot.slane %v2189_v52, 5  ;;  %v537_v54 = vld [vmem:[%s2537_s7] sm:$0xff]  ;;  %v538_v55 = vld [vmem:[%s2537_s7 + $0x8] sm:$0xff]  ;;  %v539_v59 = vld [vmem:[%s2537_s7 + $0x10] sm:$0xff] }
  0x2f   :  { %v191_v13 = vor.u32 %v190_v6, %v187_v5  ;;  %v168_v15 = vrot.slane %v167_v8, 4  ;;  %v200_v17 = vrot.slane %v198_v10, 4  ;;  %v1555_v37 = vrot.slane %v392_v35, 9  ;;  %v541_v62 = vld [vmem:[%s2537_s7 + $0x20] sm:$0xff]  ;;  %v542_v63 = vld [vmem:[%s2537_s7 + $0x28] sm:$0xff]  ;;  %v544_v2 = vld [vmem:[%s2537_s7 + $0x38] sm:$0xff] }
  0x30   :  { %v178_v16 = vrot.slane %v177_v9, 4  ;;  %v206_v22 = vrot.slane %v204_v11, 5  ;;  %v405_v38 = vrot.slane %v403_v32, 4  ;;  %v1548_v42 = vcombine.low %v2195_v58, %v2198_v60  ;;  %v546_v5 = vld [vmem:[%s2537_s7 + $0x48] sm:$0xff]  ;;  %v547_v7 = vld [vmem:[%s2537_s7 + $0x50] sm:$0xff]  ;;  %v548_v8 = vld [vmem:[%s2537_s7 + $0x58] sm:$0xff] }
  0x31   :  { %v192_v18 = vrot.slane %v191_v13, 4  ;;  %v173_v19 = vsel %vm2209_vm11, %v168_v15, %v172_v1  ;;  %v201_v21 = vor.u32 %v200_v17, %v196_v14  ;;  %v404_v40 = vsel %vm2239_vm15, %v1555_v37, %v403_v32  ;;  %v543_v1 = vld [vmem:[%s2537_s7 + $0x30] sm:$0xff]  ;;  %v549_v10 = vld [vmem:[%s2537_s7 + $0x60] sm:$0xff]  ;;  %v550_v11 = vld [vmem:[%s2537_s7 + $0x68] sm:$0xff] }
  0x32   :  { %v183_v20 = vsel %vm2209_vm11, %v178_v16, %v182_v4  ;;  %v407_v41 = vsel %vm2239_vm15, %v405_v38, %v406_v28  ;;  %v410_v45 = vrot.slane %v2198_v60, 5  ;;  %v413_v48 = vrot.slane %v2202_v3, 5  ;;  %v540_v60 = vld [vmem:[%s2537_s7 + $0x18] sm:$0xff]  ;;  %v545_v4 = vld [vmem:[%s2537_s7 + $0x40] sm:$0xff]  ;;  %v551_v13 = vld [vmem:[%s2537_s7 + $0x70] sm:$0xff] }
  0x33   :  { %v1539_v23 = vcombine.low %v173_v19, %v183_v20  ;;  %v197_v24 = vsel %vm2209_vm11, %v192_v18, %v196_v14  ;;  %v202_v25 = vrot.slane %v201_v21, 4  ;;  %v1565_v43 = vcombine.low %v404_v40, %v407_v41  ;;  %v552_v15 = vld [vmem:[%s2537_s7 + $0x78] sm:$0xff]  ;;  %v133_v20 = vld [vmem:[#allocation3 + $0xc] sm:$0x1]  ;;  %v137_v21 = vld [vmem:[#allocation3 + $0x8] sm:$0x1] }
  0x34   :  { %v1556_v49 = vrot.slane %v393_v47, 9  ;;  %v412_v50 = vrot.slane %v410_v45, 4  ;;  %v2275_v57 = vpack.c.bf16 %v538_v55, %v537_v54  ;;  %v2046_v58 = vmov 0.0|0.0   ;;  %v130_v18 = vld [vmem:[#allocation3] sm:$0x1] }
  0x35   :  { %1709 = vmatprep.mubr.msk.bf16.mxu0 %vm247_vm12, %v1539_v23  ;;  %v207_v29 = vsel %vm2209_vm11, %v202_v25, %v206_v22  ;;  %v2286_v61 = vpack.c.bf16 %v540_v60, %v539_v59  ;;  %v2297_v0 = vpack.c.bf16 %v542_v63, %v541_v62  ;;  %v2307_v3 = vpack.c.bf16 %v544_v2, %v543_v1 }
  0x36   :  { %v1540_v33 = vcombine.low %v197_v24, %v207_v29  ;;  %v411_v52 = vsel %vm2239_vm15, %v1556_v49, %v410_v45  ;;  %v414_v53 = vsel %vm2239_vm15, %v412_v50, %v413_v48  ;;  %v2317_v6 = vpack.c.bf16 %v546_v5, %v545_v4  ;;  %v140_v24 = vld [vmem:[#allocation3 + $0x14] sm:$0x1] }
  0x37   :  { %v1566_v56 = vcombine.low %v411_v52, %v414_v53  ;;  %v2327_v9 = vpack.c.bf16 %v548_v8, %v547_v7  ;;  %v2340_v14 = vpack.c.bf16 %v550_v11, %v549_v10  ;;  %v2048_v16 = vmov 0.0  }
  0x38   :  { %1710 = vmatmul.mubr.msk.bf16.vlgmr.msra.gmra.mrb[0].mxu0 %vm247_vm12, %v1540_v33  ;;  %v131_v19 = vsel %vm2349_vm4, 0, %v130_v18  ;;  %1772 = vmatprep.subr.mxu1 %v2048_v16  ;;  %v134_v22 = vsel %vm2349_vm4, 0, %v133_v20  ;;  %v138_v23 = vsel %vm136_vm5, 0, %v137_v21  ;;  %v1899_v25 = vpack.c.bf16 %v552_v15, %v551_v13  ;;  %v650_v13 = vld [vmem:[%s2534_s4] sm:$0x1]  ;;  %v1965_v21 = vld [vmem:[#allocation4 + $0x40] sm:$0xff]  }
  0x39   :  { %1714 = vmatpush3.bf16.msra.mxu0 %v2166_v30  ;;  %1721 = vmatprep.mubr.msk.bf16.mxu0 %vm247_vm12, %v1547_v31  ;;  %v1960_v30 = vld [vmem:[%s2531_s1 + $0x40] sm:$0xff]   ;;  %132 = vst [vmem:[#allocation3] sm:$0x1] %v131_v19  ;;  %135 = vst [vmem:[#allocation3 + $0xc] sm:$0x1] %v134_v22  ;;  %v1966_v22 = vld [vmem:[#allocation4 + $0x48] sm:$0xff]  }
  0x3a   :  { %1715 = vmatprep.subr.bf16.mxu0 %v1956_v26  ;;  %1774 = vmatprep.mubr.msk.f32.mxu1 %vm2047_vm2, %v2048_v16  ;;  %139 = vst [vmem:[#allocation3 + $0x8] sm:$0x1] %v138_v23  ;;  %v2049_v1 = vmov 1966171168   ;;  %v1967_v23 = vld [vmem:[#allocation4 + $0x50] sm:$0xff]  }
  0x3b   :  { %v634_v2 = vunpack.c.l.s4 %v2049_v1 }
  0x3d   :  { %1716 = vmatpush3.bf16.msra.mxu0 %v1956_v26  ;;  %v141_v26 = vsel %vm136_vm5, 0, %v140_v24  ;;  %v1968_v24 = vld [vmem:[#allocation4 + $0x58] sm:$0xff]  }
  0x3e   :  { %1717 = vmatprep.subr.bf16.mxu0 %v1957_v34  ;;  %142 = vst [vmem:[#allocation3 + $0x14] sm:$0x1] %v141_v26  ;;  %v1970_v26 = vld [vmem:[#allocation4 + $0x68] sm:$0xff]  }
  0x41   :  { %1718 = vmatpush3.bf16.msra.mxu0 %v1957_v34 }
  0x42   :  { %1719 = vmatprep.subr.bf16.mxu0 %v1958_v36 }
  0x45   :  { %1720 = vmatpush3.bf16.msra.mxu0 %v1958_v36 }
  0x46   :  { %1725 = vmatprep.subr.bf16.mxu0 %v1960_v30 }
  0x48   :  { %1722 = vmatmul.mubr.msk.bf16.vlgmr.msra.gmra.mrb[0].mxu0 %vm247_vm12, %v1548_v42 }
  0x49   :  { %1726 = vmatpush3.bf16.msra.mxu0 %v1960_v30  ;;  %1733 = vmatprep.mubr.msk.bf16.mxu0 %vm247_vm12, %v1565_v43 }
  0x4a   :  { %1727 = vmatprep.subr.bf16.mxu0 %v1962_v44 }
  0x4d   :  { %1728 = vmatpush3.bf16.msra.mxu0 %v1962_v44 }
  0x4e   :  { %1729 = vmatprep.subr.bf16.mxu0 %v1963_v46 }
  0x51   :  { %1730 = vmatpush3.bf16.msra.mxu0 %v1963_v46 }
  0x52   :  { %1731 = vmatprep.subr.bf16.mxu0 %v1964_v51 }
  0x55   :  { %1732 = vmatpush3.bf16.msra.mxu0 %v1964_v51 }
  0x56   :  { %1877 = vmatprep.subr.bf16.mxu0 %v2046_v58 }
  0x58   :  { %1734 = vmatmul.mubr.msk.bf16.vlgmr.msra.gmra.mrb[0].mxu0 %vm247_vm12, %v1566_v56  ;;  %v2405_v56 = vld [vmem:[%s2538_s8] sm:$0xff] }
  0x59   :  { %1879 = vmatpush3.bf16.msra.mxu0 %v2275_v57  ;;  %1769 = vmatprep.mubr.msk.f32.mxu0 %vm2047_vm2, %v2048_v16 }
  0x5a   :  { %1880 = vmatprep.subr.bf16.mxu0 %v2046_v58  ;;  %1773 = vmatpush3.msra.mxu1 %v2405_v56 }
  0x5b   :  { %1777 = vmatprep.subr.bf16.mxu1 %v1965_v21 }
  0x5d   :  { %1882 = vmatpush3.bf16.msra.mxu0 %v2286_v61 }
  0x5e   :  { %1883 = vmatprep.subr.bf16.mxu0 %v2046_v58 }
  0x61   :  { %1885 = vmatpush3.bf16.msra.mxu0 %v2297_v0 }
  0x62   :  { %1886 = vmatprep.subr.bf16.mxu0 %v2046_v58 }
  0x65   :  { %1888 = vmatpush3.bf16.msra.mxu0 %v2307_v3 }
  0x66   :  { %1889 = vmatprep.subr.bf16.mxu0 %v2046_v58 }
  0x69   :  { %1891 = vmatpush3.bf16.msra.mxu0 %v2317_v6 }
  0x6a   :  { %1892 = vmatprep.subr.bf16.mxu0 %v2046_v58 }
  0x6d   :  { %1894 = vmatpush3.bf16.msra.mxu0 %v2327_v9 }
  0x6e   :  { %1895 = vmatprep.subr.bf16.mxu0 %v2046_v58 }
  0x71   :  { %1897 = vmatpush3.bf16.msra.mxu0 %v2340_v14 }
  0x72   :  { %1898 = vmatprep.subr.bf16.mxu0 %v2046_v58 }
  0x75   :  { %1900 = vmatpush3.bf16.msra.mxu0 %v1899_v25 }
  0x76   :  { %1901 = vmatprep.subr.bf16.mxu0 %v2046_v58 }
 0x12b   :  { %v2365_v28 = vpop.f32.mrb[0].mxu0 }
 0x12c   :  { %v2367_v29 = vpop.f32.mrb[1].mxu0  ;;  %v524_v36 = vmul.f32 %v2365_v28, %v2365_v28 }
 0x12d   :  { %v2369_v31 = vpop.f32.mrb[2].mxu0  ;;  %v522_v33 = vmul.f32 %v2367_v29, %v2367_v29 }
 0x12e   :  { %v2371_v32 = vpop.f32.mrb[3].mxu0  ;;  %v525_v30 = vmul.f32 %v2369_v31, %v2369_v31 }
 0x12f   :  { %v513_v34 = vadd.f32 %v2371_v32, %v2367_v29  ;;  %v523_v35 = vmul.f32 %v2371_v32, %v2371_v32 }
 0x131   :  { %v514_v37 = vadd.f32 %v2365_v28, %v513_v34  ;;  %v526_v38 = vadd.f32 %v523_v35, %v522_v33  ;;  %v1971_v33 = vld [vmem:[#allocation4 + $0x70] sm:$0xff]   ;;  %v1972_v34 = vld [vmem:[#allocation4 + $0x78] sm:$0xff]   ;;  %v2427_v35 = vld [vmem:[#allocation4] sm:$0xff]  }
 0x133   :  { %v515_v40 = vadd.f32 %v2369_v31, %v514_v37  ;;  %v527_v41 = vadd.f32 %v526_v38, %v524_v36 }
 0x135   :  { %v516_v42 = vrot.slane %v515_v40, 4  ;;  %v528_v43 = vadd.f32 %v527_v41, %v525_v30 }
 0x137   :  { %v517_v44 = vadd.f32 %v516_v42, %v515_v40  ;;  %v529_v45 = vrot.slane %v528_v43, 4 }
 0x139   :  { %v518_v46 = vrot.slane %v517_v44, 2  ;;  %v530_v47 = vadd.f32 %v529_v45, %v528_v43 }
 0x13b   :  { %v519_v48 = vadd.f32 %v518_v46, %v517_v44  ;;  %v531_v49 = vrot.slane %v530_v47, 2 }
 0x13d   :  { %v520_v50 = vrot.slane %v519_v48, 1  ;;  %v532_v51 = vadd.f32 %v531_v49, %v530_v47 }
 0x13f   :  { %v533_v52 = vrot.slane %v532_v51, 1  ;;  %v521_v53 = vadd.f32 %v520_v50, %v519_v48 }
 0x141   :  { %v534_v54 = vadd.f32 %v533_v52, %v532_v51 }
 0x143   :  { %v536_v55 = vsel %vm128_vm0, %v521_v53, %v534_v54 }
 0x144   :  { %1770 = vmatmul.mubr.f32.vlgmr.msra.gmra.mrb[4].mxu0 %v536_v55 }
 0x145   :  { %1903 = vmatpush3.bf16.msra.mxu0 %v2275_v57  ;;  %1869 = vmatprep.mubr.msk.f32.mxu0 %vm2047_vm2, %v2048_v16 }
 0x146   :  { %1904 = vmatprep.subr.bf16.mxu0 %v2046_v58 }
 0x149   :  { %1906 = vmatpush3.bf16.msra.mxu0 %v2286_v61 }
 0x14a   :  { %1907 = vmatprep.subr.bf16.mxu0 %v2046_v58 }
 0x14d   :  { %1909 = vmatpush3.bf16.msra.mxu0 %v2297_v0 }
 0x14e   :  { %1910 = vmatprep.subr.bf16.mxu0 %v2046_v58 }
 0x151   :  { %1912 = vmatpush3.bf16.msra.mxu0 %v2307_v3  ;;  %v636_v3 = vlaneseq }
 0x152   :  { %1913 = vmatprep.subr.bf16.mxu0 %v2046_v58 }
 0x153   :  { %v2408_v4 = vshrl.u32 %v636_v3, 7 }
 0x155   :  { %1915 = vmatpush3.bf16.msra.mxu0 %v2317_v6  ;;  %v2422_v15 = vsub.s32 0, %v2408_v4  ;;  %v745_v36 = vsub.s32 1, %v2408_v4 }
 0x156   :  { %1916 = vmatprep.subr.bf16.mxu0 %v2046_v58 }
 0x159   :  { %1918 = vmatpush3.bf16.msra.mxu0 %v2327_v9  ;;  %v629_v9 = vld [vmem:[%s2533_s3] sm:$0x1] }
 0x15a   :  { %1919 = vmatprep.subr.bf16.mxu0 %v2046_v58 }
 0x15d   :  { %1921 = vmatpush3.bf16.msra.mxu0 %v2340_v14 }
 0x15e   :  { %1922 = vmatprep.subr.bf16.mxu0 %v2046_v58  ;;  %v635_v58 = vunpack.c.0.s8 %v634_v2 }
 0x160   :  { %v2411_v5 = vsub.s32 %v635_v58, %v2408_v4 }
 0x161   :  { %1924 = vmatpush3.bf16.msra.mxu0 %v1899_v25  ;;  %v1969_v25 = vld [vmem:[#allocation4 + $0x60] sm:$0xff]  }
 0x217   :  { %v619_v57 = vpop.f32.mrb[4].mxu0 }
 0x218   :  { %v623_v59 = vmul.f32 0.001953125, %v619_v57  ;;  %v1771_v60 = vpop.f32.mrb[5].mxu0 }
 0x21a   :  { %v624_v61 = vmul.f32 %v623_v59, %v623_v59 }
 0x21c   :  { %v626_v62 = vrot.slane %v624_v61, 7 }
 0x21e   :  { %v628_v63 = vsub.f32 %v623_v59, %v626_v62 }
 0x220   :  { %v630_v0 = vadd.f32 1e-05, %v628_v63  ;;  %v809_v63 = vld [vmem:[#allocation3] sm:$0xf] }
 0x222   :  { %1991 = vrsqrt.f32 %v630_v0 }
 0x22c   :  { %v1992_v6 = vpop.eup %1991 }
 0x22d   :  { %v639_v7 = vrot.slane %v1992_v6, %v2411_v5  ;;  %v813_v6 = vld [vmem:[#allocation3 + $0x8] sm:$0x1] }
 0x22f   :  { %v640_v8 = vcombine.high %v639_v7, %v639_v7 }
 0x231   :  { %v647_v10 = vrot.slane %v640_v8, %v2411_v5 }
 0x233   :  { %v649_v11 = vmul.f32 %v647_v10, %v629_v9 }
 0x235   :  { %v651_v14 = vmul.f32 %v649_v11, %v623_v59 }
 0x237   :  { %v652_v18 = vsub.f32 %v650_v13, %v651_v14  ;;  %v820_v13 = vld [vmem:[#allocation3 + $0x14] sm:$0x1] }
 0x239   :  { %v657_v19 = vrot.slane %v652_v18, %v2422_v15 }
 0x23b   :  { %v659_v20 = vsel %vm128_vm0, %v649_v11, %v657_v19  ;;  %v816_v11 = vld [vmem:[#allocation3 + $0xc] sm:$0xf] }
 0x23c   :  { %1775 = vmatmul.mubr.msk.f32.vlgmr.msra.gmra.mrb[0].mxu1 %vm661_vm1, %v659_v20 }
 0x23d   :  { %1778 = vmatpush3.bf16.msra.mxu1 %v1965_v21 }
 0x23e   :  { %1779 = vmatprep.subr.bf16.mxu1 %v1966_v22 }
 0x241   :  { %1780 = vmatpush3.bf16.msra.mxu1 %v1966_v22 }
 0x242   :  { %1781 = vmatprep.subr.bf16.mxu1 %v1967_v23 }
 0x245   :  { %1782 = vmatpush3.bf16.msra.mxu1 %v1967_v23 }
 0x246   :  { %1783 = vmatprep.subr.bf16.mxu1 %v1968_v24 }
 0x249   :  { %1784 = vmatpush3.bf16.msra.mxu1 %v1968_v24 }
 0x24a   :  { %1785 = vmatprep.subr.bf16.mxu1 %v1969_v25 }
 0x24d   :  { %1786 = vmatpush3.bf16.msra.mxu1 %v1969_v25 }
 0x24e   :  { %1787 = vmatprep.subr.bf16.mxu1 %v1970_v26 }
 0x251   :  { %1788 = vmatpush3.bf16.msra.mxu1 %v1970_v26 }
 0x252   :  { %1789 = vmatprep.subr.bf16.mxu1 %v1971_v33 }
 0x255   :  { %1790 = vmatpush3.bf16.msra.mxu1 %v1971_v33 }
 0x256   :  { %1791 = vmatprep.subr.bf16.mxu1 %v1972_v34 }
 0x259   :  { %1792 = vmatpush3.bf16.msra.mxu1 %v1972_v34 }
 0x25a   :  { %1797 = vmatprep.subr.bf16.mxu1 %v2427_v35 }
 0x30f   :  { %v731_v37 = vpop.f32.mrb[0].mxu1 }
 0x310   :  { %v738_v38 = vrot.slane %v731_v37, %v2422_v15  ;;  %v1776_v30 = vpop.f32.mrb[1].mxu1  ;;  %v746_v40 = vrot.slane %v731_v37, %v745_v36 }
 0x312   :  { %v739_v41 = vmul.f32 %v738_v38, %v2367_v29  ;;  %v740_v42 = vmul.f32 %v738_v38, %v2371_v32  ;;  %v741_v43 = vmul.f32 %v2365_v28, %v738_v38  ;;  %v742_v44 = vmul.f32 %v2369_v31, %v738_v38 }
 0x314   :  { %v747_v45 = vadd.f32 %v746_v40, %v739_v41  ;;  %v748_v46 = vadd.f32 %v746_v40, %v740_v42  ;;  %v749_v47 = vadd.f32 %v746_v40, %v741_v43  ;;  %v750_v48 = vadd.f32 %v746_v40, %v742_v44 }
 0x316   :  { %v751_v49 = vmax.f32 %v747_v45, 0.0  ;;  %v752_v50 = vmax.f32 %v748_v46, 0.0  ;;  %v753_v51 = vmax.f32 %v749_v47, 0.0  ;;  %v754_v52 = vmax.f32 %v750_v48, 0.0 }
 0x318   :  { %v1611_v53 = vpack.c.bf16 %v751_v49, %v751_v49  ;;  %v1612_v54 = vpack.c.bf16 %v752_v50, %v752_v50  ;;  %v1613_v55 = vpack.c.bf16 %v753_v51, %v753_v51  ;;  %v1614_v57 = vpack.c.bf16 %v754_v52, %v754_v52 }
 0x31a   :  { %v768_v59 = vshrl.u32 %v1611_v53, 16  ;;  %v776_v29 = vshrl.u32 %v1612_v54, 16  ;;  %v785_v32 = vshrl.u32 %v1613_v55, 16  ;;  %v793_v60 = vshrl.u32 %v1614_v57, 16 }
 0x31b   :  { %v771_v61 = vshll.u32 %v1611_v53, 16  ;;  %v779_v62 = vshll.u32 %v1612_v54, 16  ;;  %v788_v1 = vshll.u32 %v1613_v55, 16  ;;  %v796_v3 = vshll.u32 %v1614_v57, 16 }
 0x31c   :  { %v770_v28 = vrot.slane %v768_v59, 7  ;;  %v778_v31 = vrot.slane %v776_v29, 7  ;;  %v787_v0 = vrot.slane %v785_v32, 7  ;;  %v795_v2 = vrot.slane %v793_v60, 7 }
 0x31e   :  { %v773_v7 = vor.u32 %v771_v61, %v770_v28  ;;  %v774_v8 = vrot.slane %v770_v28, 4  ;;  %v781_v9 = vor.u32 %v779_v62, %v778_v31  ;;  %v783_v10 = vrot.slane %v778_v31, 4 }
 0x31f   :  { %v790_v14 = vor.u32 %v788_v1, %v787_v0  ;;  %v791_v18 = vrot.slane %v787_v0, 4  ;;  %v798_v19 = vor.u32 %v796_v3, %v795_v2  ;;  %v800_v20 = vrot.slane %v795_v2, 4 }
 0x320   :  { %v782_v21 = vsel %vm2159_vm7, %v774_v8, %v781_v9  ;;  %v810_v22 = vsel %vm2439_vm8, %v773_v7, %v809_v63  ;;  %v814_v23 = vsel %vm2349_vm4, %v783_v10, %v813_v6 }
 0x321   :  { %v799_v24 = vsel %vm2159_vm7, %v791_v18, %v798_v19  ;;  %811 = vst [vmem:[#allocation3] sm:$0xf] %v810_v22  ;;  %812 = vst [vmem:[#allocation3 + $0x4] sm:$0xf] %v782_v21  ;;  %v817_v25 = vsel %vm2439_vm8, %v790_v14, %v816_v11  ;;  %v821_v26 = vsel %vm2349_vm4, %v800_v20, %v820_v13  ;;  %v1975_v19 = vld [vmem:[#allocation4 + $0x8] sm:$0xff]   ;;  %v1977_v22 = vld [vmem:[#allocation4 + $0x18] sm:$0xff]  }
 0x322   :  { %815 = vst [vmem:[#allocation3 + $0x8] sm:$0x1] %v814_v23  ;;  %818 = vst [vmem:[#allocation3 + $0xc] sm:$0xf] %v817_v25  ;;  %v1978_v23 = vld [vmem:[#allocation4 + $0x20] sm:$0xff]   ;;  %v1980_v25 = vld [vmem:[#allocation4 + $0x30] sm:$0xff]  }
 0x323   :  { %819 = vst [vmem:[#allocation3 + $0x10] sm:$0xf] %v799_v24  ;;  %822 = vst [vmem:[#allocation3 + $0x14] sm:$0x1] %v821_v26  ;;  %v1979_v24 = vld [vmem:[#allocation4 + $0x28] sm:$0xff]  }
 0x328   :  { %v823_v33 = vld [vmem:[#allocation3] sm:$0xf]  ;;  %v2455_v34 = vld [vmem:[#allocation3 + $0x4] sm:$0xf] }
 0x329   :  { %v2457_v37 = vld [vmem:[#allocation3 + $0x8] sm:$0x1]  ;;  %v846_v38 = vshrl.u32 %v823_v33, 16  ;;  %v849_v27 = vshll.u32 %v823_v33, 16  ;;  %v855_v30 = vshll.u32 %v2455_v34, 16  ;;  %v859_v40 = vshrl.u32 %v2455_v34, 16 }
 0x32a   :  { %v2461_v41 = vld [vmem:[#allocation3 + $0xc] sm:$0xf]  ;;  %v865_v42 = vshll.u32 %v2457_v37, 16  ;;  %v2464_v17 = vld [vmem:[#allocation3 + $0x10] sm:$0xf]  ;;  %v1588_v21 = vcombine.low %v823_v33, %v2455_v34  ;;  %v1132_v26 = vrot.slane %v2455_v34, 5 }
 0x32b   :  { %v870_v43 = vshrl.u32 %v2461_v41, 16  ;;  %v848_v44 = vrot.slane %v846_v38, 4  ;;  %v851_v45 = vrot.slane %v849_v27, 5  ;;  %v857_v46 = vrot.slane %v855_v30, 5  ;;  %v844_v48 = vld [vmem:[#allocation3 + $0x14] sm:$0x1] }
 0x32c   :  { %v861_v47 = vrot.slane %v859_v40, 4  ;;  %v873_v50 = vshll.u32 %v2461_v41, 16  ;;  %v879_v51 = vshll.u32 %v2464_v17, 16  ;;  %v883_v54 = vshrl.u32 %v2464_v17, 16  ;;  %v1125_v55 = vld [vmem:[#allocation3 + $0xc] sm:$0xe] }
 0x32d   :  { %v872_v49 = vrot.slane %v870_v43, 4  ;;  %v852_v52 = vor.u32 %v851_v45, %v848_v44  ;;  %v867_v57 = vrot.slane %v865_v42, 5  ;;  %v889_v61 = vshll.u32 %v844_v48, 16  ;;  %v1124_v33 = vld [vmem:[#allocation3] sm:$0xe]  ;;  %v1983_v27 = vld [vmem:[#allocation4 + $0x80] sm:$0xff]  }
 0x32e   :  { %v862_v53 = vor.u32 %v861_v47, %v857_v46  ;;  %v875_v59 = vrot.slane %v873_v50, 5  ;;  %v881_v29 = vrot.slane %v879_v51, 5  ;;  %v885_v28 = vrot.slane %v883_v54, 4  ;;  %v1984_v44 = vld [vmem:[#allocation4 + $0x88] sm:$0xff]   ;;  %v1987_v47 = vld [vmem:[#allocation4 + $0xa0] sm:$0xff]  }
 0x32f   :  { %v853_v32 = vrot.slane %v852_v52, 4  ;;  %v1599_v62 = vrot.slane %v1125_v55, 9  ;;  %v1139_v2 = vrot.slane %v2464_v17, 5  ;;  %v891_v7 = vrot.slane %v889_v61, 5 }
 0x330   :  { %v863_v60 = vrot.slane %v862_v53, 4  ;;  %v876_v31 = vor.u32 %v875_v59, %v872_v49  ;;  %v886_v1 = vor.u32 %v885_v28, %v881_v29  ;;  %v1142_v9 = vrot.slane %v844_v48, 5 }
 0x331   :  { %v858_v63 = vsel %vm2209_vm11, %v853_v32, %v857_v46  ;;  %v1141_v8 = vrot.slane %v1139_v2, 4  ;;  %v2481_v13 = vsel %vm2239_vm15, %v1599_v62, %v1139_v2  ;;  %v1134_v38 = vrot.slane %v1132_v26, 4  ;;  %v1985_v46 = vld [vmem:[#allocation4 + $0x90] sm:$0xff]  }
 0x332   :  { %v868_v0 = vsel %vm2209_vm11, %v863_v60, %v867_v57  ;;  %v877_v58 = vrot.slane %v876_v31, 4  ;;  %v887_v6 = vrot.slane %v886_v1, 4  ;;  %v1598_v30 = vrot.slane %v1124_v33, 9 }
 0x333   :  { %v1578_v3 = vcombine.low %v858_v63, %v868_v0  ;;  %v2485_v14 = vsel %vm2239_vm15, %v1141_v8, %v1142_v9  ;;  %v1135_v40 = vrot.slane %v2457_v37, 5  ;;  %v1589_v43 = vcombine.low %v2461_v41, %v2464_v17  ;;  %v1986_v37 = vld [vmem:[#allocation4 + $0x98] sm:$0xff]   ;;  %v1988_v41 = vld [vmem:[#allocation4 + $0xa8] sm:$0xff]  }
 0x334   :  { %v882_v10 = vsel %vm2209_vm11, %v877_v58, %v881_v29  ;;  %v892_v11 = vsel %vm2209_vm11, %v887_v6, %v891_v7  ;;  %v1601_v20 = vcombine.low %v2481_v13, %v2485_v14  ;;  %v1133_v34 = vsel %vm2239_vm15, %v1598_v30, %v1132_v26  ;;  %v1990_v17 = vld [vmem:[#allocation4 + $0xb8] sm:$0xff]  }
 0x335   :  { %1793 = vmatprep.mubr.bf16.mxu1 %v1578_v3  ;;  %v1579_v18 = vcombine.low %v882_v10, %v892_v11  ;;  %v1136_v42 = vsel %vm2239_vm15, %v1134_v38, %v1135_v40 }
 0x336   :  { %v1600_v45 = vcombine.low %v1133_v34, %v1136_v42 }
 0x337   :  { %1794 = vmatmul.mubr.bf16.vlgmr.msra.gmra.mrb[4].mxu1 %v1579_v18 }
 0x338   :  { %1798 = vmatpush3.bf16.msra.mxu1 %v2427_v35  ;;  %1813 = vmatprep.mubr.bf16.mxu1 %v1588_v21  ;;  %v1981_v35 = vld [vmem:[#allocation4 + $0x38] sm:$0xff]  }
 0x339   :  { %1799 = vmatprep.subr.bf16.mxu1 %v1975_v19 }
 0x33c   :  { %1800 = vmatpush3.bf16.msra.mxu1 %v1975_v19 }
 0x33d   :  { %1801 = vmatprep.subr.bf16.mxu1 %v1976_v12 }
 0x340   :  { %1802 = vmatpush3.bf16.msra.mxu1 %v1976_v12  ;;  %v1385_v12 = vld [vmem:[%s2535_s5] sm:$0x1]  ;;  %s2050_s5 = smov [#allocation7]  }
 0x341   :  { %1803 = vmatprep.subr.bf16.mxu1 %v1977_v22 }
 0x344   :  { %1804 = vmatpush3.bf16.msra.mxu1 %v1977_v22 }
 0x345   :  { %1805 = vmatprep.subr.bf16.mxu1 %v1978_v23 }
 0x348   :  { %1806 = vmatpush3.bf16.msra.mxu1 %v1978_v23 }
 0x349   :  { %1807 = vmatprep.subr.bf16.mxu1 %v1979_v24 }
 0x34c   :  { %1808 = vmatpush3.bf16.msra.mxu1 %v1979_v24  ;;  %v1406_v24 = vld [vmem:[%s2536_s6] sm:$0x1]  ;;  %s1519_s6 = sshll.u32 %s2050_s5, 4  ;;  %s1520_s6 = int_to_ptr.vmem [resolvable:$true] %s1519_s6 }
 0x34d   :  { %1809 = vmatprep.subr.bf16.mxu1 %v1980_v25  ;;  %s2017_s22 = scalar_lea.vmem %s1520_s6, 512  ;;  %p2022_p9 = scmp.lt.s32.totalorder %s1520_s6, %s1520_s6 }
 0x34e   :  { %p2018_p8 = scmp.ne.s32.totalorder %s1520_s6, %s2017_s22  ;;  %p2023_p10 = scmp.lt.s32.totalorder %s2017_s22, %s2017_s22 }
 0x350   :  { %1810 = vmatpush3.bf16.msra.mxu1 %v1980_v25  ;;  %p2024_p11 = por %p2023_p10, %p2022_p9 }
 0x351   :  { %1811 = vmatprep.subr.bf16.mxu1 %v1981_v35 }
 0x352   :  { %p2025_p12 = pnand %p2024_p11, %p2018_p8 }
 0x354   :  { %1812 = vmatpush3.bf16.msra.mxu1 %v1981_v35 }
 0x355   :  { %1817 = vmatprep.subr.bf16.mxu1 %v1983_v27 }
 0x357   :  { %1814 = vmatmul.mubr.bf16.vlgmr.msra.gmra.mrb[4].mxu1 %v1589_v43 }
 0x358   :  { %1818 = vmatpush3.bf16.msra.mxu1 %v1983_v27  ;;  %1833 = vmatprep.mubr.bf16.mxu1 %v1600_v45 }
 0x359   :  { %1819 = vmatprep.subr.bf16.mxu1 %v1984_v44 }
 0x35c   :  { %1820 = vmatpush3.bf16.msra.mxu1 %v1984_v44 }
 0x35d   :  { %1821 = vmatprep.subr.bf16.mxu1 %v1985_v46 }
 0x360   :  { %1822 = vmatpush3.bf16.msra.mxu1 %v1985_v46 }
 0x361   :  { %1823 = vmatprep.subr.bf16.mxu1 %v1986_v37 }
 0x364   :  { %1824 = vmatpush3.bf16.msra.mxu1 %v1986_v37 }
 0x365   :  { %1825 = vmatprep.subr.bf16.mxu1 %v1987_v47 }
 0x368   :  { %1826 = vmatpush3.bf16.msra.mxu1 %v1987_v47 }
 0x369   :  { %1827 = vmatprep.subr.bf16.mxu1 %v1988_v41 }
 0x36c   :  { %1828 = vmatpush3.bf16.msra.mxu1 %v1988_v41 }
 0x36d   :  { %1829 = vmatprep.subr.bf16.mxu1 %v1989_v39 }
 0x370   :  { %1830 = vmatpush3.bf16.msra.mxu1 %v1989_v39 }
 0x371   :  { %1831 = vmatprep.subr.bf16.mxu1 %v1990_v17 }
 0x374   :  { %1832 = vmatpush3.bf16.msra.mxu1 %v1990_v17 }
 0x375   :  { %1872 = vmatprep.subr.mxu1 %v2048_v16 }
 0x377   :  { %1834 = vmatmul.mubr.bf16.vlgmr.msra.gmra.mrb[4].mxu1 %v1601_v20 }
 0x378   :  { %1873 = vmatpush3.msra.mxu1 %v2405_v56  ;;  %1874 = vmatprep.mubr.msk.f32.mxu1 %vm2047_vm2, %v2048_v16 }
 0x44a   :  { %v1835_v48 = vpop.f32.mrb[4].mxu1 }
 0x44b   :  { %v1251_v49 = vpop.f32.mrb[5].mxu1  ;;  %v1281_v55 = vmul.f32 %v1835_v48, %v1835_v48 }
 0x44c   :  { %v1836_v50 = vpop.f32.mrb[6].mxu1  ;;  %v1279_v52 = vmul.f32 %v1251_v49, %v1251_v49 }
 0x44d   :  { %v1254_v51 = vpop.f32.mrb[7].mxu1  ;;  %v1282_v29 = vmul.f32 %v1836_v50, %v1836_v50 }
 0x44e   :  { %v1270_v53 = vadd.f32 %v1254_v51, %v1251_v49  ;;  %v1280_v54 = vmul.f32 %v1254_v51, %v1254_v51 }
 0x450   :  { %v1271_v57 = vadd.f32 %v1835_v48, %v1270_v53  ;;  %v1283_v59 = vadd.f32 %v1280_v54, %v1279_v52 }
 0x452   :  { %v1272_v32 = vadd.f32 %v1836_v50, %v1271_v57  ;;  %v1284_v60 = vadd.f32 %v1283_v59, %v1281_v55 }
 0x454   :  { %v1273_v28 = vrot.slane %v1272_v32, 4  ;;  %v1285_v61 = vadd.f32 %v1284_v60, %v1282_v29 }
 0x456   :  { %v1274_v31 = vadd.f32 %v1273_v28, %v1272_v32  ;;  %v1286_v56 = vrot.slane %v1285_v61, 4 }
 0x458   :  { %v1275_v62 = vrot.slane %v1274_v31, 2  ;;  %v1287_v63 = vadd.f32 %v1286_v56, %v1285_v61 }
 0x45a   :  { %v1276_v16 = vadd.f32 %v1275_v62, %v1274_v31  ;;  %v1288_v0 = vrot.slane %v1287_v63, 2 }
 0x45c   :  { %v1277_v1 = vrot.slane %v1276_v16, 1  ;;  %v1289_v2 = vadd.f32 %v1288_v0, %v1287_v63 }
 0x45e   :  { %v1290_v3 = vrot.slane %v1289_v2, 1  ;;  %v1278_v58 = vadd.f32 %v1277_v1, %v1276_v16 }
 0x460   :  { %v1291_v6 = vadd.f32 %v1290_v3, %v1289_v2 }
 0x462   :  { %v1292_v7 = vsel %vm128_vm0, %v1278_v58, %v1291_v6 }
 0x463   :  { %1870 = vmatmul.mubr.f32.vlgmr.msra.gmra.mrb[6].mxu0 %v1292_v7 }
 0x536   :  { %v1375_v8 = vpop.f32.mrb[6].mxu0 }
 0x537   :  { %v1379_v9 = vmul.f32 0.001953125, %v1375_v8  ;;  %v1871_v10 = vpop.f32.mrb[7].mxu0 }
 0x539   :  { %v1380_v11 = vmul.f32 %v1379_v9, %v1379_v9 }
 0x53b   :  { %v1382_v13 = vrot.slane %v1380_v11, 7 }
 0x53d   :  { %v1384_v14 = vsub.f32 %v1379_v9, %v1382_v13 }
 0x53f   :  { %v1386_v18 = vadd.f32 1e-05, %v1384_v14 }
 0x541   :  { %1993 = vrsqrt.f32 %v1386_v18 }
 0x54b   :  { %v1994_v19 = vpop.eup %1993 }
 0x54c   :  { %v1395_v20 = vrot.slane %v1994_v19, %v2411_v5 }
 0x54e   :  { %v1396_v21 = vcombine.high %v1395_v20, %v1395_v20 }
 0x550   :  { %v1403_v22 = vrot.slane %v1396_v21, %v2411_v5 }
 0x552   :  { %v1405_v23 = vmul.f32 %v1403_v22, %v1385_v12 }
 0x554   :  { %v1407_v25 = vmul.f32 %v1405_v23, %v1379_v9 }
 0x556   :  { %v1408_v26 = vsub.f32 %v1406_v24, %v1407_v25 }
 0x558   :  { %v1413_v35 = vrot.slane %v1408_v26, %v2422_v15 }
 0x55a   :  { %v1415_v33 = vsel %vm128_vm0, %v1405_v23, %v1413_v35 }
 0x55b   :  { %1875 = vmatmul.mubr.msk.f32.vlgmr.msra.gmra.mrb[2].mxu1 %vm661_vm1, %v1415_v33 }
 0x62e   :  { %v1486_v38 = vpop.f32.mrb[2].mxu1 }
 0x62f   :  { %v1493_v27 = vrot.slane %v1486_v38, %v2422_v15  ;;  %v1876_v30 = vpop.f32.mrb[3].mxu1  ;;  %v1501_v5 = vrot.slane %v1486_v38, %v745_v36 }
 0x631   :  { %v1494_v40 = vmul.f32 %v1493_v27, %v1251_v49  ;;  %v1495_v42 = vmul.f32 %v1493_v27, %v1254_v51  ;;  %v1496_v43 = vmul.f32 %v1835_v48, %v1493_v27  ;;  %v1497_v34 = vmul.f32 %v1836_v50, %v1493_v27 }
 0x633   :  { %v1502_v44 = vadd.f32 %v1501_v5, %v1494_v40  ;;  %v1503_v45 = vadd.f32 %v1501_v5, %v1495_v42  ;;  %v1504_v46 = vadd.f32 %v1501_v5, %v1496_v43  ;;  %v1505_v37 = vadd.f32 %v1501_v5, %v1497_v34 }
 0x635   :  { %v1506_v47 = vmax.f32 %v1502_v44, 0.0  ;;  %v1507_v41 = vmax.f32 %v1503_v45, 0.0  ;;  %v1508_v39 = vmax.f32 %v1504_v46, 0.0  ;;  %v1509_v17 = vmax.f32 %v1505_v37, 0.0 }
 0x637   :  { %1510 = vst [vmem:[#allocation7] sm:$0xff] %v1506_v47  ;;  %1511 = vst [vmem:[#allocation7 + $0x8] sm:$0xff] %v1507_v41 }
 0x638   :  { %1512 = vst [vmem:[#allocation7 + $0x10] sm:$0xff] %v1508_v39  ;;  %1513 = vst [vmem:[#allocation7 + $0x18] sm:$0xff] %v1509_v17 }
 0x639   :  { %2028 = shalt.err (!%p2025_p12)
}
 0x63a   :  { %s2029_s25 = scalar_lea.hbm %s2539_s9, 512 }
 0x63b   :  { %p2030_p13 = scmp.ne.s32.totalorder %s2539_s9, %s2029_s25  ;;  %p2033_p0 = scmp.lt.u32.totalorder %s2029_s25, %s2539_s9 }
 0x63d   :  { %p2035_p1 = pnand %p2033_p0, %p2030_p13 }
 0x63f   :  { %2038 = shalt.err (!%p2035_p1)
}
 0x640   :  { %s2051_s29 = smov 128   ;;  %s2052_s30 = smov 8  }
 0x641   :  { %1525 = dma.vmem_to_hbm [thread:$0]  %s1520_s6, 512, %s2539_s9, [#allocation6], %s2051_s29, %s2051_s29, %s2052_s30  }
 0x642   :  { %2041 = dma.done.wait [#allocation6], 512  }
 0x643   :  { %2042 = vsyncadd [#allocation6], 4294966784 }
 0x644   :  { %1529 = vsyncpa [#allocation5], 1 }
 0x645   :  { %1530 = vsyncpa [#allocation6], 1 }

</bundles_post_ra>
